<compile_context>
chip_gen: v7x
topology: tpu7x:2x2x1
jax: 0.10.0
libtpu: 0.0.40
codegen_flags: <defaults>
</compile_context>

<pallas_src>
import numpy as np
import jax
import jax.numpy as jnp
from jax.experimental import pallas as pl
from jax.experimental.pallas import tpu as pltpu


_LANE = 128
_SUBLANE = 8


def _round_up(v, m):
    return ((v + m - 1) // m) * m


def _pad2d(a, rows, cols):
    a = jnp.asarray(a, jnp.float32)
    return jnp.pad(a, ((0, rows - a.shape[0]), (0, cols - a.shape[1])))


# ----------------------------------------------------------------------------
# Fused Pallas kernel: both residual MLPs in one body, one batch tile per step.
# All weight refs are full (VMEM-resident across the batch grid); inputs /
# outputs are (TB, features) tiles with lane-dense (128-padded) feature axes.
# ----------------------------------------------------------------------------
def _hf_fused_kernel(
    x_ref, u_ref,
    # hn weights (pre-transposed to (in, out), 128-padded)
    h_wlin, h_blin, h_w1, h_b1, h_w2, h_b2, h_w3, h_b3,
    # fn weights; first-layer weights split into x-rows / u-rows (no concat)
    f_wlx, f_wlu, f_blin, f_w1x, f_w1u, f_b1, f_w2, f_b2, f_w3, f_b3,
    # outputs
    y_ref, xn_ref,
):
    f32 = jnp.float32
    x = x_ref[...].astype(f32)
    u = u_ref[...].astype(f32)

    # --- hn: y = x @ Wlin + b + Lin3(tanh(Lin2(tanh(Lin1(x))))) ---
    h_lin = jnp.dot(x, h_wlin[...], preferred_element_type=f32) + h_blin[...]
    h1 = jnp.tanh(jnp.dot(x, h_w1[...], preferred_element_type=f32) + h_b1[...])
    h2 = jnp.tanh(jnp.dot(h1, h_w2[...], preferred_element_type=f32) + h_b2[...])
    y_ref[...] = (h_lin
                  + jnp.dot(h2, h_w3[...], preferred_element_type=f32)
                  + h_b3[...]).astype(y_ref.dtype)

    # --- fn: xnext = ResNet_f([x, u]) with the concat folded into split weights ---
    f_lin = (jnp.dot(x, f_wlx[...], preferred_element_type=f32)
             + jnp.dot(u, f_wlu[...], preferred_element_type=f32)
             + f_blin[...])
    g1 = jnp.tanh(jnp.dot(x, f_w1x[...], preferred_element_type=f32)
                  + jnp.dot(u, f_w1u[...], preferred_element_type=f32)
                  + f_b1[...])
    g2 = jnp.tanh(jnp.dot(g1, f_w2[...], preferred_element_type=f32) + f_b2[...])
    xn_ref[...] = (f_lin
                   + jnp.dot(g2, f_w3[...], preferred_element_type=f32)
                   + f_b3[...]).astype(xn_ref.dtype)


# ----------------------------------------------------------------------------
# One-time parameter preparation (transpose / pad / split) — done outside the
# hot forward path so no per-call HBM weight rewrites happen.
# ----------------------------------------------------------------------------
def prepare_kernel_params(hn_params, fn_params, *, nx, nu_flat, ny):
    ny_shape = tuple() if ny is None else (ny,) if isinstance(ny, int) else tuple(ny)
    ny_flat = int(np.prod(ny_shape, dtype=int))

    hid_h = hn_params["w1"].shape[0]
    hid_f = fn_params["w1"].shape[0]
    ny_pad = _round_up(max(ny_flat, 1), _LANE)
    nx_pad = _round_up(nx, _LANE)
    hid_h_pad = _round_up(hid_h, _LANE)
    hid_f_pad = _round_up(hid_f, _LANE)

    def t(w):  # torch (out, in) -> (in, out)
        return jnp.asarray(w, jnp.float32).T

    def row(b):  # (out,) -> (1, out)
        return jnp.asarray(b, jnp.float32).reshape(1, -1)

    # hn (input = x only)
    h_wlin = _pad2d(t(hn_params["wlin"]), nx, ny_pad)
    h_blin = _pad2d(row(hn_params["blin"]), 1, ny_pad)
    h_w1 = _pad2d(t(hn_params["w1"]), nx, hid_h_pad)
    h_b1 = _pad2d(row(hn_params["b1"]), 1, hid_h_pad)
    h_w2 = _pad2d(t(hn_params["w2"]), hid_h_pad, hid_h_pad)
    h_b2 = _pad2d(row(hn_params["b2"]), 1, hid_h_pad)
    h_w3 = _pad2d(t(hn_params["w3"]), hid_h_pad, ny_pad)
    h_b3 = _pad2d(row(hn_params["b3"]), 1, ny_pad)

    # fn (input = [x, u]); split first-layer weights by input rows
    f_wlin_t = t(fn_params["wlin"])   # (nx+nu, nx)
    f_w1_t = t(fn_params["w1"])       # (nx+nu, hid_f)
    f_wlx = _pad2d(f_wlin_t[:nx], nx, nx_pad)
    f_wlu = _pad2d(f_wlin_t[nx:], nu_flat, nx_pad)
    f_blin = _pad2d(row(fn_params["blin"]), 1, nx_pad)
    f_w1x = _pad2d(f_w1_t[:nx], nx, hid_f_pad)
    f_w1u = _pad2d(f_w1_t[nx:], nu_flat, hid_f_pad)
    f_b1 = _pad2d(row(fn_params["b1"]), 1, hid_f_pad)
    f_w2 = _pad2d(t(fn_params["w2"]), hid_f_pad, hid_f_pad)
    f_b2 = _pad2d(row(fn_params["b2"]), 1, hid_f_pad)
    f_w3 = _pad2d(t(fn_params["w3"]), hid_f_pad, nx_pad)
    f_b3 = _pad2d(row(fn_params["b3"]), 1, nx_pad)

    weights = (h_wlin, h_blin, h_w1, h_b1, h_w2, h_b2, h_w3, h_b3,
               f_wlx, f_wlu, f_blin, f_w1x, f_w1u, f_b1, f_w2, f_b2, f_w3, f_b3)

    return {
        "weights": weights,
        "nx": nx, "nu_flat": nu_flat,
        "ny_shape": ny_shape, "ny_flat": ny_flat,
        "ny_pad": ny_pad, "nx_pad": nx_pad,
        "hid_h_pad": hid_h_pad, "hid_f_pad": hid_f_pad,
    }


# ----------------------------------------------------------------------------
# hf_net_default forward (feedthrough=False, default): y = hn(x), xnext = fn(x, u)
# ----------------------------------------------------------------------------
def hf_net_default_forward(x, u, kp, *, block_batch=256):
    B = x.shape[0]
    nx, nu_flat = kp["nx"], kp["nu_flat"]
    u_flat = u.reshape(B, -1)

    # Batch padding / tiling: multiple of 8 sublanes; tile of `block_batch`
    # rows for large batches (sized comfortably under v7x's 64 MiB VMEM even
    # with double-buffered input tiles).
    block_batch = _round_up(block_batch, _SUBLANE)
    B_pad = _round_up(B, _SUBLANE)
    if B_pad > block_batch:
        tb = block_batch
        B_pad = _round_up(B_pad, tb)
    else:
        tb = B_pad

    if B_pad != B:
        x_in = jnp.pad(x, ((0, B_pad - B), (0, 0)))
        u_in = jnp.pad(u_flat, ((0, B_pad - B), (0, 0)))
    else:
        x_in, u_in = x, u_flat

    grid = (B_pad // tb,)
    weights = kp["weights"]

    def batched(width):
        return pl.BlockSpec((tb, width), lambda b: (b, 0))

    def resident(arr):
        return pl.BlockSpec(arr.shape, lambda b: (0, 0))

    in_specs = [batched(nx), batched(nu_flat)] + [resident(w) for w in weights]
    out_specs = (pl.BlockSpec((tb, kp["ny_pad"]), lambda b: (b, 0)),
                 pl.BlockSpec((tb, kp["nx_pad"]), lambda b: (b, 0)))
    out_shape = (jax.ShapeDtypeStruct((B_pad, kp["ny_pad"]), jnp.float32),
                 jax.ShapeDtypeStruct((B_pad, kp["nx_pad"]), jnp.float32))

    # Advisory cost estimate so XLA schedules the custom call sensibly.
    hh, hf = kp["hid_h_pad"], kp["hid_f_pad"]
    nyp, nxp = kp["ny_pad"], kp["nx_pad"]
    flops = 2 * B_pad * (nx * nyp + nx * hh + hh * hh + hh * nyp
                         + (nx + nu_flat) * nxp + (nx + nu_flat) * hf
                         + hf * hf + hf * nxp)
    transcendentals = 2 * B_pad * (hh + hf)
    bytes_w = sum(int(np.prod(w.shape)) * 4 for w in weights)
    bytes_io = 4 * B_pad * (nx + nu_flat + nyp + nxp)
    cost = pl.CostEstimate(flops=int(flops),
                           transcendentals=int(transcendentals),
                           bytes_accessed=int(bytes_w + bytes_io))

    y_pad, xn_pad = pl.pallas_call(
        _hf_fused_kernel,
        grid=grid,
        in_specs=in_specs,
        out_specs=out_specs,
        out_shape=out_shape,
        compiler_params=pltpu.CompilerParams(
            dimension_semantics=("parallel",)),   # shards batch over v7x's 2 TCs
        cost_estimate=cost,
    )(x_in, u_in, *weights)

    y = y_pad[:B, :kp["ny_flat"]].reshape((B,) + kp["ny_shape"])
    xnext = xn_pad[:B, :nx]
    return y, xnext


# ----------------------------------------------------------------------------
# Parameter construction (deterministic, synthetic init, torch convention)
# ----------------------------------------------------------------------------
def make_res_net_params(key, n_in, n_out, n_hidden=64):
    ks = jax.random.split(key, 8)
    scale = 0.2
    return {
        "wlin": scale * jax.random.normal(ks[0], (n_out, n_in), jnp.float32),
        "blin": scale * jax.random.normal(ks[1], (n_out,), jnp.float32),
        "w1":   scale * jax.random.normal(ks[2], (n_hidden, n_in), jnp.float32),
        "b1":   scale * jax.random.normal(ks[3], (n_hidden,), jnp.float32),
        "w2":   scale * jax.random.normal(ks[4], (n_hidden, n_hidden), jnp.float32),
        "b2":   scale * jax.random.normal(ks[5], (n_hidden,), jnp.float32),
        "w3":   scale * jax.random.normal(ks[6], (n_out, n_hidden), jnp.float32),
        "b3":   scale * jax.random.normal(ks[7], (n_out,), jnp.float32),
    }


# ----------------------------------------------------------------------------
# Pure-JAX reference for validation
# ----------------------------------------------------------------------------
def _res_net_ref(x, p):
    lin = x @ p["wlin"].T + p["blin"]
    h1 = jnp.tanh(x @ p["w1"].T + p["b1"])
    h2 = jnp.tanh(h1 @ p["w2"].T + p["b2"])
    ff = h2 @ p["w3"].T + p["b3"]
    return lin + ff


def _hf_ref(x, u, hn_params, fn_params, ny):
    B = x.shape[0]
    y = _res_net_ref(x, hn_params).reshape((B,) + ((ny,) if isinstance(ny, int) else tuple(ny)))
    xu = jnp.concatenate([x, u.reshape(B, -1)], axis=1)
    return y, _res_net_ref(xu, fn_params)


if __name__ == "__main__":
    # sizes consistent with the module: state nx, input nu, output ny
    nx, nu, ny = 8, 3, 2
    hidden = 64  # n_nodes_per_layer (module default)

    key = jax.random.PRNGKey(0)
    k_x, k_u, k_hn, k_fn, k_x2, k_u2 = jax.random.split(key, 6)

    hn_params = make_res_net_params(k_hn, n_in=nx, n_out=ny, n_hidden=hidden)
    fn_params = make_res_net_params(k_fn, n_in=nx + nu, n_out=nx, n_hidden=hidden)

    # one-time weight prep (transpose / pad to 128 lanes / split fn's concat)
    kp = prepare_kernel_params(hn_params, fn_params, nx=nx, nu_flat=nu, ny=ny)

    # --- small batch (module-scale) ---
    B = 2
    x = jax.random.normal(k_x, (B, nx), jnp.float32)
    u = jax.random.normal(k_u, (B, nu), jnp.float32)

    y, xnext = hf_net_default_forward(x, u, kp)
    jax.block_until_ready((y, xnext))

    y_ref, xnext_ref = _hf_ref(x, u, hn_params, fn_params, ny)
    assert y.shape == (B, ny) and xnext.shape == (B, nx)
    np.testing.assert_allclose(np.asarray(y), np.asarray(y_ref), rtol=1e-5, atol=1e-5)
    np.testing.assert_allclose(np.asarray(xnext), np.asarray(xnext_ref), rtol=1e-5, atol=1e-5)

    # --- larger batch: exercises batch padding + grid tiling (grid > 1) ---
    B2 = 300
    x2 = jax.random.normal(k_x2, (B2, nx), jnp.float32)
    u2 = jax.random.normal(k_u2, (B2, nu), jnp.float32)

    y2, xnext2 = hf_net_default_forward(x2, u2, kp, block_batch=256)
    jax.block_until_ready((y2, xnext2))

    y2_ref, xnext2_ref = _hf_ref(x2, u2, hn_params, fn_params, ny)
    assert y2.shape == (B2, ny) and xnext2.shape == (B2, nx)
    np.testing.assert_allclose(np.asarray(y2), np.asarray(y2_ref), rtol=1e-5, atol=1e-5)
    np.testing.assert_allclose(np.asarray(xnext2), np.asarray(xnext2_ref), rtol=1e-5, atol=1e-5)

    print("KERNEL_OK")
</pallas_src>

<mosaic_0001>
module attributes {stable_mosaic.version = 11 : i64} {
  func.func @_hf_fused_kernel(%arg0: i32, %arg1: memref<8x8xf32, #tpu.memory_space<vmem>>, %arg2: memref<8x3xf32, #tpu.memory_space<vmem>>, %arg3: memref<8x128xf32, #tpu.memory_space<vmem>>, %arg4: memref<1x128xf32, #tpu.memory_space<vmem>>, %arg5: memref<8x128xf32, #tpu.memory_space<vmem>>, %arg6: memref<1x128xf32, #tpu.memory_space<vmem>>, %arg7: memref<128x128xf32, #tpu.memory_space<vmem>>, %arg8: memref<1x128xf32, #tpu.memory_space<vmem>>, %arg9: memref<128x128xf32, #tpu.memory_space<vmem>>, %arg10: memref<1x128xf32, #tpu.memory_space<vmem>>, %arg11: memref<8x128xf32, #tpu.memory_space<vmem>>, %arg12: memref<3x128xf32, #tpu.memory_space<vmem>>, %arg13: memref<1x128xf32, #tpu.memory_space<vmem>>, %arg14: memref<8x128xf32, #tpu.memory_space<vmem>>, %arg15: memref<3x128xf32, #tpu.memory_space<vmem>>, %arg16: memref<1x128xf32, #tpu.memory_space<vmem>>, %arg17: memref<128x128xf32, #tpu.memory_space<vmem>>, %arg18: memref<1x128xf32, #tpu.memory_space<vmem>>, %arg19: memref<128x128xf32, #tpu.memory_space<vmem>>, %arg20: memref<1x128xf32, #tpu.memory_space<vmem>>, %arg21: memref<8x128xf32, #tpu.memory_space<vmem>>, %arg22: memref<8x128xf32, #tpu.memory_space<vmem>>) attributes {dimension_semantics = [#tpu.dimension_semantics<parallel>], iteration_bounds = array<i64: 1>, scalar_prefetch = 0 : i64, scratch_operands = 0 : i64, tpu.core_type = #tpu.core_type<tc>, window_params = [{transform_indices = @transform_0, window_bounds = array<i64: 8, 8>}, {transform_indices = @transform_1, window_bounds = array<i64: 8, 3>}, {pipeline_mode = #tpu.pipeline_mode<synchronous>, transform_indices = @transform_2, window_bounds = array<i64: 8, 128>}, {pipeline_mode = #tpu.pipeline_mode<synchronous>, transform_indices = @transform_3, window_bounds = array<i64: 1, 128>}, {pipeline_mode = #tpu.pipeline_mode<synchronous>, transform_indices = @transform_4, window_bounds = array<i64: 8, 128>}, {pipeline_mode = #tpu.pipeline_mode<synchronous>, transform_indices = @transform_5, window_bounds = array<i64: 1, 128>}, {pipeline_mode = #tpu.pipeline_mode<synchronous>, transform_indices = @transform_6, window_bounds = array<i64: 128, 128>}, {pipeline_mode = #tpu.pipeline_mode<synchronous>, transform_indices = @transform_7, window_bounds = array<i64: 1, 128>}, {pipeline_mode = #tpu.pipeline_mode<synchronous>, transform_indices = @transform_8, window_bounds = array<i64: 128, 128>}, {pipeline_mode = #tpu.pipeline_mode<synchronous>, transform_indices = @transform_9, window_bounds = array<i64: 1, 128>}, {pipeline_mode = #tpu.pipeline_mode<synchronous>, transform_indices = @transform_10, window_bounds = array<i64: 8, 128>}, {pipeline_mode = #tpu.pipeline_mode<synchronous>, transform_indices = @transform_11, window_bounds = array<i64: 3, 128>}, {pipeline_mode = #tpu.pipeline_mode<synchronous>, transform_indices = @transform_12, window_bounds = array<i64: 1, 128>}, {pipeline_mode = #tpu.pipeline_mode<synchronous>, transform_indices = @transform_13, window_bounds = array<i64: 8, 128>}, {pipeline_mode = #tpu.pipeline_mode<synchronous>, transform_indices = @transform_14, window_bounds = array<i64: 3, 128>}, {pipeline_mode = #tpu.pipeline_mode<synchronous>, transform_indices = @transform_15, window_bounds = array<i64: 1, 128>}, {pipeline_mode = #tpu.pipeline_mode<synchronous>, transform_indices = @transform_16, window_bounds = array<i64: 128, 128>}, {pipeline_mode = #tpu.pipeline_mode<synchronous>, transform_indices = @transform_17, window_bounds = array<i64: 1, 128>}, {pipeline_mode = #tpu.pipeline_mode<synchronous>, transform_indices = @transform_18, window_bounds = array<i64: 128, 128>}, {pipeline_mode = #tpu.pipeline_mode<synchronous>, transform_indices = @transform_19, window_bounds = array<i64: 1, 128>}, {transform_indices = @transform_20, window_bounds = array<i64: 8, 128>}, {transform_indices = @transform_21, window_bounds = array<i64: 8, 128>}]} {
    %c0 = arith.constant 0 : index
    %c0_0 = arith.constant 0 : index
    %0 = vector.load %arg1[%c0, %c0_0] : memref<8x8xf32, #tpu.memory_space<vmem>>, vector<8x8xf32>
    %c0_1 = arith.constant 0 : index
    %c0_2 = arith.constant 0 : index
    %1 = vector.load %arg2[%c0_1, %c0_2] : memref<8x3xf32, #tpu.memory_space<vmem>>, vector<8x3xf32>
    %c0_3 = arith.constant 0 : index
    %c0_4 = arith.constant 0 : index
    %2 = vector.load %arg3[%c0_3, %c0_4] : memref<8x128xf32, #tpu.memory_space<vmem>>, vector<8x128xf32>
    %cst = arith.constant dense<0.000000e+00> : vector<8x128xf32>
    %3 = tpu.matmul %0, %2, %cst {dimension_numbers = #tpu.dot_dimension_numbers<[1], [0], [0], [1], [0, 0, 1, 1], [], []>} : vector<8x8xf32>, vector<8x128xf32>, vector<8x128xf32> -> vector<8x128xf32>
    %c0_5 = arith.constant 0 : index
    %c0_6 = arith.constant 0 : index
    %4 = vector.load %arg4[%c0_5, %c0_6] : memref<1x128xf32, #tpu.memory_space<vmem>>, vector<1x128xf32>
    %5 = vector.broadcast %4 : vector<1x128xf32> to vector<8x128xf32>
    %6 = arith.addf %3, %5 : vector<8x128xf32>
    %c0_7 = arith.constant 0 : index
    %c0_8 = arith.constant 0 : index
    %7 = vector.load %arg5[%c0_7, %c0_8] : memref<8x128xf32, #tpu.memory_space<vmem>>, vector<8x128xf32>
    %cst_9 = arith.constant dense<0.000000e+00> : vector<8x128xf32>
    %8 = tpu.matmul %0, %7, %cst_9 {dimension_numbers = #tpu.dot_dimension_numbers<[1], [0], [0], [1], [0, 0, 1, 1], [], []>} : vector<8x8xf32>, vector<8x128xf32>, vector<8x128xf32> -> vector<8x128xf32>
    %c0_10 = arith.constant 0 : index
    %c0_11 = arith.constant 0 : index
    %9 = vector.load %arg6[%c0_10, %c0_11] : memref<1x128xf32, #tpu.memory_space<vmem>>, vector<1x128xf32>
    %10 = vector.broadcast %9 : vector<1x128xf32> to vector<8x128xf32>
    %11 = arith.addf %8, %10 : vector<8x128xf32>
    %12 = math.tanh %11 : vector<8x128xf32>
    %c0_12 = arith.constant 0 : index
    %c0_13 = arith.constant 0 : index
    %13 = vector.load %arg7[%c0_12, %c0_13] : memref<128x128xf32, #tpu.memory_space<vmem>>, vector<128x128xf32>
    %cst_14 = arith.constant dense<0.000000e+00> : vector<8x128xf32>
    %14 = tpu.matmul %12, %13, %cst_14 {dimension_numbers = #tpu.dot_dimension_numbers<[1], [0], [0], [1], [0, 0, 1, 1], [], []>} : vector<8x128xf32>, vector<128x128xf32>, vector<8x128xf32> -> vector<8x128xf32>
    %c0_15 = arith.constant 0 : index
    %c0_16 = arith.constant 0 : index
    %15 = vector.load %arg8[%c0_15, %c0_16] : memref<1x128xf32, #tpu.memory_space<vmem>>, vector<1x128xf32>
    %16 = vector.broadcast %15 : vector<1x128xf32> to vector<8x128xf32>
    %17 = arith.addf %14, %16 : vector<8x128xf32>
    %18 = math.tanh %17 : vector<8x128xf32>
    %c0_17 = arith.constant 0 : index
    %c0_18 = arith.constant 0 : index
    %19 = vector.load %arg9[%c0_17, %c0_18] : memref<128x128xf32, #tpu.memory_space<vmem>>, vector<128x128xf32>
    %cst_19 = arith.constant dense<0.000000e+00> : vector<8x128xf32>
    %20 = tpu.matmul %18, %19, %cst_19 {dimension_numbers = #tpu.dot_dimension_numbers<[1], [0], [0], [1], [0, 0, 1, 1], [], []>} : vector<8x128xf32>, vector<128x128xf32>, vector<8x128xf32> -> vector<8x128xf32>
    %21 = arith.addf %6, %20 : vector<8x128xf32>
    %c0_20 = arith.constant 0 : index
    %c0_21 = arith.constant 0 : index
    %22 = vector.load %arg10[%c0_20, %c0_21] : memref<1x128xf32, #tpu.memory_space<vmem>>, vector<1x128xf32>
    %23 = vector.broadcast %22 : vector<1x128xf32> to vector<8x128xf32>
    %24 = arith.addf %21, %23 : vector<8x128xf32>
    %c0_22 = arith.constant 0 : index
    %c0_23 = arith.constant 0 : index
    %25 = vector.load %arg21[%c0_22, %c0_23] : memref<8x128xf32, #tpu.memory_space<vmem>>, vector<8x128xf32>
    tpu.vector_store %arg21[%c0_22, %c0_23], %24 {strides = array<i32>} : memref<8x128xf32, #tpu.memory_space<vmem>>, vector<8x128xf32>,
    %c0_24 = arith.constant 0 : index
    %c0_25 = arith.constant 0 : index
    %26 = vector.load %arg11[%c0_24, %c0_25] : memref<8x128xf32, #tpu.memory_space<vmem>>, vector<8x128xf32>
    %cst_26 = arith.constant dense<0.000000e+00> : vector<8x128xf32>
    %27 = tpu.matmul %0, %26, %cst_26 {dimension_numbers = #tpu.dot_dimension_numbers<[1], [0], [0], [1], [0, 0, 1, 1], [], []>} : vector<8x8xf32>, vector<8x128xf32>, vector<8x128xf32> -> vector<8x128xf32>
    %c0_27 = arith.constant 0 : index
    %c0_28 = arith.constant 0 : index
    %28 = vector.load %arg12[%c0_27, %c0_28] : memref<3x128xf32, #tpu.memory_space<vmem>>, vector<3x128xf32>
    %cst_29 = arith.constant dense<0.000000e+00> : vector<8x128xf32>
    %29 = tpu.matmul %1, %28, %cst_29 {dimension_numbers = #tpu.dot_dimension_numbers<[1], [0], [0], [1], [0, 0, 1, 1], [], []>} : vector<8x3xf32>, vector<3x128xf32>, vector<8x128xf32> -> vector<8x128xf32>
    %30 = arith.addf %27, %29 : vector<8x128xf32>
    %c0_30 = arith.constant 0 : index
    %c0_31 = arith.constant 0 : index
    %31 = vector.load %arg13[%c0_30, %c0_31] : memref<1x128xf32, #tpu.memory_space<vmem>>, vector<1x128xf32>
    %32 = vector.broadcast %31 : vector<1x128xf32> to vector<8x128xf32>
    %33 = arith.addf %30, %32 : vector<8x128xf32>
    %c0_32 = arith.constant 0 : index
    %c0_33 = arith.constant 0 : index
    %34 = vector.load %arg14[%c0_32, %c0_33] : memref<8x128xf32, #tpu.memory_space<vmem>>, vector<8x128xf32>
    %cst_34 = arith.constant dense<0.000000e+00> : vector<8x128xf32>
    %35 = tpu.matmul %0, %34, %cst_34 {dimension_numbers = #tpu.dot_dimension_numbers<[1], [0], [0], [1], [0, 0, 1, 1], [], []>} : vector<8x8xf32>, vector<8x128xf32>, vector<8x128xf32> -> vector<8x128xf32>
    %c0_35 = arith.constant 0 : index
    %c0_36 = arith.constant 0 : index
    %36 = vector.load %arg15[%c0_35, %c0_36] : memref<3x128xf32, #tpu.memory_space<vmem>>, vector<3x128xf32>
    %cst_37 = arith.constant dense<0.000000e+00> : vector<8x128xf32>
    %37 = tpu.matmul %1, %36, %cst_37 {dimension_numbers = #tpu.dot_dimension_numbers<[1], [0], [0], [1], [0, 0, 1, 1], [], []>} : vector<8x3xf32>, vector<3x128xf32>, vector<8x128xf32> -> vector<8x128xf32>
    %38 = arith.addf %35, %37 : vector<8x128xf32>
    %c0_38 = arith.constant 0 : index
    %c0_39 = arith.constant 0 : index
    %39 = vector.load %arg16[%c0_38, %c0_39] : memref<1x128xf32, #tpu.memory_space<vmem>>, vector<1x128xf32>
    %40 = vector.broadcast %39 : vector<1x128xf32> to vector<8x128xf32>
    %41 = arith.addf %38, %40 : vector<8x128xf32>
    %42 = math.tanh %41 : vector<8x128xf32>
    %c0_40 = arith.constant 0 : index
    %c0_41 = arith.constant 0 : index
    %43 = vector.load %arg17[%c0_40, %c0_41] : memref<128x128xf32, #tpu.memory_space<vmem>>, vector<128x128xf32>
    %cst_42 = arith.constant dense<0.000000e+00> : vector<8x128xf32>
    %44 = tpu.matmul %42, %43, %cst_42 {dimension_numbers = #tpu.dot_dimension_numbers<[1], [0], [0], [1], [0, 0, 1, 1], [], []>} : vector<8x128xf32>, vector<128x128xf32>, vector<8x128xf32> -> vector<8x128xf32>
    %c0_43 = arith.constant 0 : index
    %c0_44 = arith.constant 0 : index
    %45 = vector.load %arg18[%c0_43, %c0_44] : memref<1x128xf32, #tpu.memory_space<vmem>>, vector<1x128xf32>
    %46 = vector.broadcast %45 : vector<1x128xf32> to vector<8x128xf32>
    %47 = arith.addf %44, %46 : vector<8x128xf32>
    %48 = math.tanh %47 : vector<8x128xf32>
    %c0_45 = arith.constant 0 : index
    %c0_46 = arith.constant 0 : index
    %49 = vector.load %arg19[%c0_45, %c0_46] : memref<128x128xf32, #tpu.memory_space<vmem>>, vector<128x128xf32>
    %cst_47 = arith.constant dense<0.000000e+00> : vector<8x128xf32>
    %50 = tpu.matmul %48, %49, %cst_47 {dimension_numbers = #tpu.dot_dimension_numbers<[1], [0], [0], [1], [0, 0, 1, 1], [], []>} : vector<8x128xf32>, vector<128x128xf32>, vector<8x128xf32> -> vector<8x128xf32>
    %51 = arith.addf %33, %50 : vector<8x128xf32>
    %c0_48 = arith.constant 0 : index
    %c0_49 = arith.constant 0 : index
    %52 = vector.load %arg20[%c0_48, %c0_49] : memref<1x128xf32, #tpu.memory_space<vmem>>, vector<1x128xf32>
    %53 = vector.broadcast %52 : vector<1x128xf32> to vector<8x128xf32>
    %54 = arith.addf %51, %53 : vector<8x128xf32>
    %c0_50 = arith.constant 0 : index
    %c0_51 = arith.constant 0 : index
    %55 = vector.load %arg22[%c0_50, %c0_51] : memref<8x128xf32, #tpu.memory_space<vmem>>, vector<8x128xf32>
    tpu.vector_store %arg22[%c0_50, %c0_51], %54 {strides = array<i32>} : memref<8x128xf32, #tpu.memory_space<vmem>>, vector<8x128xf32>,
    return
  }
  func.func @transform_0(%arg0: i32) -> (i32, i32) {
    %c0_i32 = arith.constant 0 : i32
    %c0_i32_0 = arith.constant 0 : i32
    return %arg0, %c0_i32 : i32, i32
  }
  func.func @transform_1(%arg0: i32) -> (i32, i32) {
    %c0_i32 = arith.constant 0 : i32
    %c0_i32_0 = arith.constant 0 : i32
    return %arg0, %c0_i32 : i32, i32
  }
  func.func @transform_2(%arg0: i32) -> (i32, i32) {
    %c0_i32 = arith.constant 0 : i32
    %c0_i32_0 = arith.constant 0 : i32
    %c0_i32_1 = arith.constant 0 : i32
    return %c0_i32, %c0_i32_0 : i32, i32
  }
  func.func @transform_3(%arg0: i32) -> (i32, i32) {
    %c0_i32 = arith.constant 0 : i32
    %c0_i32_0 = arith.constant 0 : i32
    %c0_i32_1 = arith.constant 0 : i32
    return %c0_i32, %c0_i32_0 : i32, i32
  }
  func.func @transform_4(%arg0: i32) -> (i32, i32) {
    %c0_i32 = arith.constant 0 : i32
    %c0_i32_0 = arith.constant 0 : i32
    %c0_i32_1 = arith.constant 0 : i32
    return %c0_i32, %c0_i32_0 : i32, i32
  }
  func.func @transform_5(%arg0: i32) -> (i32, i32) {
    %c0_i32 = arith.constant 0 : i32
    %c0_i32_0 = arith.constant 0 : i32
    %c0_i32_1 = arith.constant 0 : i32
    return %c0_i32, %c0_i32_0 : i32, i32
  }
  func.func @transform_6(%arg0: i32) -> (i32, i32) {
    %c0_i32 = arith.constant 0 : i32
    %c0_i32_0 = arith.constant 0 : i32
    %c0_i32_1 = arith.constant 0 : i32
    return %c0_i32, %c0_i32_0 : i32, i32
  }
  func.func @transform_7(%arg0: i32) -> (i32, i32) {
    %c0_i32 = arith.constant 0 : i32
    %c0_i32_0 = arith.constant 0 : i32
    %c0_i32_1 = arith.constant 0 : i32
    return %c0_i32, %c0_i32_0 : i32, i32
  }
  func.func @transform_8(%arg0: i32) -> (i32, i32) {
    %c0_i32 = arith.constant 0 : i32
    %c0_i32_0 = arith.constant 0 : i32
    %c0_i32_1 = arith.constant 0 : i32
    return %c0_i32, %c0_i32_0 : i32, i32
  }
  func.func @transform_9(%arg0: i32) -> (i32, i32) {
    %c0_i32 = arith.constant 0 : i32
    %c0_i32_0 = arith.constant 0 : i32
    %c0_i32_1 = arith.constant 0 : i32
    return %c0_i32, %c0_i32_0 : i32, i32
  }
  func.func @transform_10(%arg0: i32) -> (i32, i32) {
    %c0_i32 = arith.constant 0 : i32
    %c0_i32_0 = arith.constant 0 : i32
    %c0_i32_1 = arith.constant 0 : i32
    return %c0_i32, %c0_i32_0 : i32, i32
  }
  func.func @transform_11(%arg0: i32) -> (i32, i32) {
    %c0_i32 = arith.constant 0 : i32
    %c0_i32_0 = arith.constant 0 : i32
    %c0_i32_1 = arith.constant 0 : i32
    return %c0_i32, %c0_i32_0 : i32, i32
  }
  func.func @transform_12(%arg0: i32) -> (i32, i32) {
    %c0_i32 = arith.constant 0 : i32
    %c0_i32_0 = arith.constant 0 : i32
    %c0_i32_1 = arith.constant 0 : i32
    return %c0_i32, %c0_i32_0 : i32, i32
  }
  func.func @transform_13(%arg0: i32) -> (i32, i32) {
    %c0_i32 = arith.constant 0 : i32
    %c0_i32_0 = arith.constant 0 : i32
    %c0_i32_1 = arith.constant 0 : i32
    return %c0_i32, %c0_i32_0 : i32, i32
  }
  func.func @transform_14(%arg0: i32) -> (i32, i32) {
    %c0_i32 = arith.constant 0 : i32
    %c0_i32_0 = arith.constant 0 : i32
    %c0_i32_1 = arith.constant 0 : i32
    return %c0_i32, %c0_i32_0 : i32, i32
  }
  func.func @transform_15(%arg0: i32) -> (i32, i32) {
    %c0_i32 = arith.constant 0 : i32
    %c0_i32_0 = arith.constant 0 : i32
    %c0_i32_1 = arith.constant 0 : i32
    return %c0_i32, %c0_i32_0 : i32, i32
  }
  func.func @transform_16(%arg0: i32) -> (i32, i32) {
    %c0_i32 = arith.constant 0 : i32
    %c0_i32_0 = arith.constant 0 : i32
    %c0_i32_1 = arith.constant 0 : i32
    return %c0_i32, %c0_i32_0 : i32, i32
  }
  func.func @transform_17(%arg0: i32) -> (i32, i32) {
    %c0_i32 = arith.constant 0 : i32
    %c0_i32_0 = arith.constant 0 : i32
    %c0_i32_1 = arith.constant 0 : i32
    return %c0_i32, %c0_i32_0 : i32, i32
  }
  func.func @transform_18(%arg0: i32) -> (i32, i32) {
    %c0_i32 = arith.constant 0 : i32
    %c0_i32_0 = arith.constant 0 : i32
    %c0_i32_1 = arith.constant 0 : i32
    return %c0_i32, %c0_i32_0 : i32, i32
  }
  func.func @transform_19(%arg0: i32) -> (i32, i32) {
    %c0_i32 = arith.constant 0 : i32
    %c0_i32_0 = arith.constant 0 : i32
    %c0_i32_1 = arith.constant 0 : i32
    return %c0_i32, %c0_i32_0 : i32, i32
  }
  func.func @transform_20(%arg0: i32) -> (i32, i32) {
    %c0_i32 = arith.constant 0 : i32
    %c0_i32_0 = arith.constant 0 : i32
    return %arg0, %c0_i32 : i32, i32
  }
  func.func @transform_21(%arg0: i32) -> (i32, i32) {
    %c0_i32 = arith.constant 0 : i32
    %c0_i32_0 = arith.constant 0 : i32
    return %arg0, %c0_i32 : i32, i32
  }
}

</mosaic_0001>

<bundles_post_ra>
// kernel: tpu_custom_call.1
= control target key start
LH: loop header
LB: loop body
LE: loop exit
PB: predicated region body
PF: predicated region fallthrough
CT: control target
= control target key end

     0   :  { %s1993_s0 = inlined_call_operand.vmem [shape: f32[8,8], index: 0, kind: input, shape index: {}]   ;;  %s1994_s1 = inlined_call_operand.vmem [shape: f32[8,3], index: 1, kind: input, shape index: {}]   ;;  %s1995_s2 = inlined_call_operand.vmem [shape: f32[8,128], index: 2, kind: input, shape index: {}]   ;;  %s1996_s3 = inlined_call_operand.vmem [shape: f32[1,128], index: 3, kind: input, shape index: {}]   ;;  %s1997_s4 = inlined_call_operand.vmem [shape: f32[8,128], index: 4, kind: input, shape index: {}]   ;;  %s1998_s5 = inlined_call_operand.hbm [shape: f32[1,128], index: 5, kind: input, shape index: {}]   ;;  %s1999_s6 = inlined_call_operand.hbm [shape: f32[128,128], index: 6, kind: input, shape index: {}]   ;;  %s2000_s7 = inlined_call_operand.hbm [shape: f32[1,128], index: 7, kind: input, shape index: {}]   ;;  %s2001_s8 = inlined_call_operand.hbm [shape: f32[128,128], index: 8, kind: input, shape index: {}]   ;;  %s2002_s9 = inlined_call_operand.hbm [shape: f32[1,128], index: 9, kind: input, shape index: {}]   ;;  %s2003_s10 = inlined_call_operand.vmem [shape: f32[8,128], index: 10, kind: input, shape index: {}]   ;;  %s2004_s11 = inlined_call_operand.vmem [shape: f32[3,128], index: 11, kind: input, shape index: {}]   ;;  %s2005_s12 = inlined_call_operand.vmem [shape: f32[1,128], index: 12, kind: input, shape index: {}]   ;;  %s2006_s13 = inlined_call_operand.vmem [shape: f32[8,128], index: 13, kind: input, shape index: {}]   ;;  %s2007_s14 = inlined_call_operand.vmem [shape: f32[3,128], index: 14, kind: input, shape index: {}]   ;;  %s2008_s15 = inlined_call_operand.vmem [shape: f32[1,128], index: 15, kind: input, shape index: {}]   ;;  %s2009_s16 = inlined_call_operand.hbm [shape: f32[128,128], index: 16, kind: input, shape index: {}]   ;;  %s2010_s17 = inlined_call_operand.vmem [shape: f32[1,128], index: 17, kind: input, shape index: {}]   ;;  %s2011_s18 = inlined_call_operand.hbm [shape: f32[128,128], index: 18, kind: input, shape index: {}]   ;;  %s2012_s19 = inlined_call_operand.vmem [shape: f32[1,128], index: 19, kind: input, shape index: {}]   ;;  %s2013_s20 = inlined_call_operand.hbm [shape: f32[8,128], index: 20, kind: output, shape index: {0}]   ;;  %s2014_s21 = inlined_call_operand.hbm [shape: f32[8,128], index: 21, kind: output, shape index: {1}]  }
   0x1   :  { %2017 = sst [smem:[#allocation23_spill]] %s1993_s0 }
   0x2   :  { %2018 = sst [smem:[#allocation24_spill]] %s1994_s1 }
   0x3   :  { %2019 = sst [smem:[#allocation25_spill]] %s1995_s2 }
   0x4   :  { %2020 = sst [smem:[#allocation26_spill]] %s1996_s3 }
   0x5   :  { %2021 = sst [smem:[#allocation27_spill]] %s1997_s4 }
   0x6   :  { %2022 = sst [smem:[#allocation28_spill]] %s1998_s5 }
   0x7   :  { %2023 = sst [smem:[#allocation29_spill]] %s2014_s21 }
   0x8   :  { %27 = vsyncpa [#allocation3], 0 }
   0x9   :  { %28 = vsyncpa [#allocation6], 0 }
   0xa   :  { %29 = vsyncpa [#allocation9], 0 }
   0xb   :  { %30 = vsyncpa [#allocation12], 0 }
   0xc   :  { %31 = vsyncpa [#allocation4], 0 }
   0xd   :  { %32 = vsyncpa [#allocation16], 0  ;;  %s1639_s2 = smov [#allocation5]   ;;  %s1429_s3 = scalar_lea.hbm %s1999_s6, 2048 }
   0xe   :  { %s58_s25 = sshll.u32 %s1639_s2, 4  ;;  %p1430_p0 = scmp.ne.s32.totalorder %s1999_s6, %s1429_s3  ;;  %s59_s25 = int_to_ptr.vmem [resolvable:$true] %s58_s25 }
   0xf   :  { %p1433_p1 = scmp.lt.u32.totalorder %s1429_s3, %s1999_s6 }
  0x11   :  { %p1435_p2 = pnand %p1433_p1, %p1430_p0 }
  0x13   :  { %1438 = shalt.err (!%p1435_p2)
}
  0x14   :  { %s1439_s30 = scalar_lea.vmem %s59_s25, 2048  ;;  %p1444_p4 = scmp.lt.s32.totalorder %s59_s25, %s59_s25 }
  0x15   :  { %p1440_p3 = scmp.ne.s32.totalorder %s59_s25, %s1439_s30  ;;  %p1445_p5 = scmp.lt.s32.totalorder %s1439_s30, %s1439_s30 }
  0x17   :  { %p1446_p6 = por %p1445_p5, %p1444_p4 }
  0x19   :  { %p1447_p7 = pnand %p1446_p6, %p1440_p3 }
  0x1b   :  { %1450 = shalt.err (!%p1447_p7)
}
  0x1c   :  { %s1640_s5 = smov 128   ;;  %s1641_s22 = smov 8  }
  0x1d   :  { %64 = dma.hbm_to_vmem [thread:$0]  %s1999_s6, 2048, %s59_s25, [#allocation6], %s1640_s5, %s1640_s5, %s1641_s22  }
  0x1e   :  { %s1642_s24 = smov [#allocation8]   ;;  %s1643_s26 = smov [#allocation11]  }
  0x1f   :  { %s80_s2 = sshll.u32 %s1642_s24, 4  ;;  %s114_s27 = sshll.u32 %s1643_s26, 4  ;;  %s81_s2 = int_to_ptr.vmem [resolvable:$true] %s80_s2  ;;  %s115_s27 = int_to_ptr.vmem [resolvable:$true] %s114_s27 }
  0x20   :  { %s1451_s29 = scalar_lea.hbm %s2001_s8, 2048 }
  0x21   :  { %p1452_p8 = scmp.ne.s32.totalorder %s2001_s8, %s1451_s29  ;;  %p1455_p9 = scmp.lt.u32.totalorder %s1451_s29, %s2001_s8 }
  0x23   :  { %p1457_p10 = pnand %p1455_p9, %p1452_p8 }
  0x25   :  { %1460 = shalt.err (!%p1457_p10)
}
  0x26   :  { %s1461_s6 = scalar_lea.vmem %s81_s2, 2048  ;;  %p1466_p12 = scmp.lt.s32.totalorder %s81_s2, %s81_s2 }
  0x27   :  { %p1462_p11 = scmp.ne.s32.totalorder %s81_s2, %s1461_s6  ;;  %p1467_p13 = scmp.lt.s32.totalorder %s1461_s6, %s1461_s6 }
  0x29   :  { %p1468_p0 = por %p1467_p13, %p1466_p12 }
  0x2b   :  { %p1469_p1 = pnand %p1468_p0, %p1462_p11 }
  0x2d   :  { %1472 = shalt.err (!%p1469_p1)
}
  0x2e   :  { %86 = dma.hbm_to_vmem [thread:$0]  %s2001_s8, 2048, %s81_s2, [#allocation9], %s1640_s5, %s1640_s5, %s1641_s22  }
  0x2f   :  { %s1473_s24 = scalar_lea.hbm %s2009_s16, 2048 }
  0x30   :  { %p1474_p2 = scmp.ne.s32.totalorder %s2009_s16, %s1473_s24  ;;  %p1477_p3 = scmp.lt.u32.totalorder %s1473_s24, %s2009_s16 }
  0x32   :  { %p1479_p4 = pnand %p1477_p3, %p1474_p2 }
  0x34   :  { %1482 = shalt.err (!%p1479_p4)
}
  0x35   :  { %s1483_s0 = scalar_lea.vmem %s115_s27, 2048  ;;  %p1488_p6 = scmp.lt.s32.totalorder %s115_s27, %s115_s27 }
  0x36   :  { %p1484_p5 = scmp.ne.s32.totalorder %s115_s27, %s1483_s0  ;;  %p1489_p7 = scmp.lt.s32.totalorder %s1483_s0, %s1483_s0 }
  0x38   :  { %p1490_p8 = por %p1489_p7, %p1488_p6 }
  0x3a   :  { %p1491_p9 = pnand %p1490_p8, %p1484_p5 }
  0x3c   :  { %1494 = shalt.err (!%p1491_p9)
}
  0x3d   :  { %120 = dma.hbm_to_vmem [thread:$0]  %s2009_s16, 2048, %s115_s27, [#allocation12], %s1640_s5, %s1640_s5, %s1641_s22  }
  0x3e   :  { %s1644_s4 = smov [#allocation2]   ;;  %s1645_s6 = smov [#allocation7]  }
  0x3f   :  { %s49_s30 = sshll.u32 %s1644_s4, 4  ;;  %s71_s25 = sshll.u32 %s1645_s6, 4  ;;  %s50_s30 = int_to_ptr.vmem [resolvable:$true] %s49_s30  ;;  %s72_s25 = int_to_ptr.vmem [resolvable:$true] %s71_s25 }
  0x40   :  { %s2024_s21 = sld [smem:[#allocation28_spill]] }
  0x46   :  { %s1495_s24 = scalar_lea.hbm %s2024_s21, 16 }
  0x47   :  { %p1496_p10 = scmp.ne.s32.totalorder %s2024_s21, %s1495_s24  ;;  %p1499_p11 = scmp.lt.u32.totalorder %s1495_s24, %s2024_s21 }
  0x49   :  { %p1501_p12 = pnand %p1499_p11, %p1496_p10 }
  0x4b   :  { %1504 = shalt.err (!%p1501_p12)
}
  0x4c   :  { %s1505_s16 = scalar_lea.vmem %s50_s30, 16  ;;  %s1509_s27 = scalar_lea.vmem %s50_s30, 32 }
  0x4d   :  { %p1506_p13 = scmp.ne.s32.totalorder %s50_s30, %s1505_s16  ;;  %p1510_p0 = scmp.lt.s32.totalorder %s50_s30, %s50_s30 }
  0x4e   :  { %p1511_p1 = scmp.lt.s32.totalorder %s1509_s27, %s1505_s16 }
  0x50   :  { %p1512_p2 = por %p1511_p1, %p1510_p0 }
  0x52   :  { %p1513_p3 = pnand %p1512_p2, %p1506_p13 }
  0x54   :  { %1516 = shalt.err (!%p1513_p3)
}
  0x55   :  { %52 = dma.hbm_to_vmem [thread:$0]  %s2024_s21, 16, %s50_s30, [#allocation3]  }
  0x56   :  { %s1517_s6 = scalar_lea.hbm %s2000_s7, 16 }
  0x57   :  { %p1518_p4 = scmp.ne.s32.totalorder %s2000_s7, %s1517_s6  ;;  %p1521_p5 = scmp.lt.u32.totalorder %s1517_s6, %s2000_s7 }
  0x59   :  { %p1523_p6 = pnand %p1521_p5, %p1518_p4 }
  0x5b   :  { %1526 = shalt.err (!%p1523_p6)
}
  0x5c   :  { %s1527_s3 = scalar_lea.vmem %s72_s25, 16  ;;  %s1531_s28 = scalar_lea.vmem %s72_s25, 32 }
  0x5d   :  { %p1528_p7 = scmp.ne.s32.totalorder %s72_s25, %s1527_s3  ;;  %p1532_p8 = scmp.lt.s32.totalorder %s72_s25, %s72_s25 }
  0x5e   :  { %p1533_p9 = scmp.lt.s32.totalorder %s1531_s28, %s1527_s3 }
  0x60   :  { %p1534_p10 = por %p1533_p9, %p1532_p8 }
  0x62   :  { %p1535_p11 = pnand %p1534_p10, %p1528_p7 }
  0x64   :  { %1538 = shalt.err (!%p1535_p11)
}
  0x65   :  { %74 = dma.hbm_to_vmem [thread:$0]  %s2000_s7, 16, %s72_s25, [#allocation6]  }
  0x66   :  { %s1646_s29 = smov [#allocation10]   ;;  %s1647_s27 = smov [#allocation13]  }
  0x67   :  { %s93_s16 = sshll.u32 %s1646_s29, 4  ;;  %s128_s0 = sshll.u32 %s1647_s27, 4  ;;  %s94_s16 = int_to_ptr.vmem [resolvable:$true] %s93_s16  ;;  %s129_s0 = int_to_ptr.vmem [resolvable:$true] %s128_s0 }
  0x68   :  { %s1539_s4 = scalar_lea.hbm %s2002_s9, 16 }
  0x69   :  { %p1540_p12 = scmp.ne.s32.totalorder %s2002_s9, %s1539_s4  ;;  %p1543_p13 = scmp.lt.u32.totalorder %s1539_s4, %s2002_s9 }
  0x6b   :  { %p1545_p0 = pnand %p1543_p13, %p1540_p12 }
  0x6d   :  { %1548 = shalt.err (!%p1545_p0)
}
  0x6e   :  { %s1549_s7 = scalar_lea.vmem %s94_s16, 16  ;;  %s1553_s25 = scalar_lea.vmem %s94_s16, 32 }
  0x6f   :  { %p1550_p1 = scmp.ne.s32.totalorder %s94_s16, %s1549_s7  ;;  %p1554_p2 = scmp.lt.s32.totalorder %s94_s16, %s94_s16 }
  0x70   :  { %p1555_p3 = scmp.lt.s32.totalorder %s1553_s25, %s1549_s7 }
  0x72   :  { %p1556_p4 = por %p1555_p3, %p1554_p2 }
  0x74   :  { %p1557_p5 = pnand %p1556_p4, %p1550_p1 }
  0x76   :  { %1560 = shalt.err (!%p1557_p5)
}
  0x77   :  { %96 = dma.hbm_to_vmem [thread:$0]  %s2002_s9, 16, %s94_s16, [#allocation9]  }
  0x78   :  { %s1561_s21 = scalar_lea.hbm %s2011_s18, 2048 }
  0x79   :  { %p1562_p6 = scmp.ne.s32.totalorder %s2011_s18, %s1561_s21  ;;  %p1565_p7 = scmp.lt.u32.totalorder %s1561_s21, %s2011_s18 }
  0x7b   :  { %p1567_p8 = pnand %p1565_p7, %p1562_p6 }
  0x7d   :  { %1570 = shalt.err (!%p1567_p8)
}
  0x7e   :  { %s1571_s4 = scalar_lea.vmem %s129_s0, 2048  ;;  %p1576_p10 = scmp.lt.s32.totalorder %s129_s0, %s129_s0 }
  0x7f   :  { %p1572_p9 = scmp.ne.s32.totalorder %s129_s0, %s1571_s4  ;;  %p1577_p11 = scmp.lt.s32.totalorder %s1571_s4, %s1571_s4 }
  0x81   :  { %p1578_p12 = por %p1577_p11, %p1576_p10 }
  0x83   :  { %p1579_p13 = pnand %p1578_p12, %p1572_p9 }
  0x85   :  { %1582 = shalt.err (!%p1579_p13)
}
  0x86   :  { %134 = dma.hbm_to_vmem [thread:$0]  %s2011_s18, 2048, %s129_s0, [#allocation12], %s1640_s5, %s1640_s5, %s1641_s22  }
  0x87   :  { %1627 = dma.done.wait [#allocation3], 16  }
  0x88   :  { %1628 = vsyncadd [#allocation3], 4294967280 }
  0x89   :  { %1629 = dma.done.wait [#allocation6], 2064  }
  0x8a   :  { %1630 = vsyncadd [#allocation6], 4294965232 }
  0x8b   :  { %1631 = dma.done.wait [#allocation9], 2064  }
  0x8c   :  { %1632 = vsyncadd [#allocation9], 4294965232 }
  0x8d   :  { %1633 = dma.done.wait [#allocation12], 4096  }
  0x8e   :  { %1634 = vsyncadd [#allocation12], 4294963200  ;;  %v1648_v0 = vmov 0.0   ;;  %vm1649_vm0 = vmmov 0   ;;  %vm168_vm1 = vcmask 64512   ;;  %s2025_s22 = sld [smem:[#allocation27_spill]] }
  0x8f   :  { %1146 = vmatprep.subr.mxu1 %v1648_v0  ;;  %1148 = vmatprep.mubr.msk.f32.mxu1 %vm1649_vm0, %v1648_v0  ;;  %s2026_s23 = sld [smem:[#allocation23_spill]]  ;;  %s2027_s7 = sld [smem:[#allocation25_spill]]  ;;  %v321_v4 = vld [vmem:[#allocation5] sm:$0xff]  ;;  %v322_v5 = vld [vmem:[#allocation5 + $0x8] sm:$0xff]  ;;  %v323_v6 = vld [vmem:[#allocation5 + $0x10] sm:$0xff]  ;;  %v1650_v9 = vmov 0.0|0.0  }
  0x90   :  { %1141 = vmatprep.subr.mxu0 %v1648_v0  ;;  %1143 = vmatprep.mubr.msk.f32.mxu0 %vm1649_vm0, %v1648_v0  ;;  %v1312_v7 = vpack.c.bf16 %v322_v5, %v321_v4  ;;  %v324_v8 = vld [vmem:[#allocation5 + $0x18] sm:$0xff]  ;;  %v325_v11 = vld [vmem:[#allocation5 + $0x20] sm:$0xff]  ;;  %v326_v12 = vld [vmem:[#allocation5 + $0x28] sm:$0xff]  ;;  %vm517_vm2 = vcmask 1042432   ;;  %s2028_s30 = sld [smem:[#allocation24_spill]]  ;;  %vm513_vm3 = vcmask 23552  }
  0x91   :  { %v1315_v10 = vpack.c.bf16 %v324_v8, %v323_v6  ;;  %v1318_v13 = vpack.c.bf16 %v326_v12, %v325_v11  ;;  %v327_v14 = vld [vmem:[#allocation5 + $0x30] sm:$0xff]  ;;  %v328_v15 = vld [vmem:[#allocation5 + $0x38] sm:$0xff]  ;;  %v329_v17 = vld [vmem:[#allocation5 + $0x40] sm:$0xff]  ;;  %s2029_s2 = sld [smem:[#allocation26_spill]]  ;;  %s1651_s18 = smov [#allocation14]  }
  0x92   :  { %v1321_v16 = vpack.c.bf16 %v328_v15, %v327_v14  ;;  %v330_v18 = vld [vmem:[#allocation5 + $0x48] sm:$0xff]  ;;  %v331_v20 = vld [vmem:[#allocation5 + $0x50] sm:$0xff]  ;;  %v332_v21 = vld [vmem:[#allocation5 + $0x58] sm:$0xff]  ;;  %s1019_s5 = sshll.u32 %s1651_s18, 4  ;;  %s1020_s5 = int_to_ptr.vmem [resolvable:$true] %s1019_s5 }
  0x93   :  { %v1324_v19 = vpack.c.bf16 %v330_v18, %v329_v17  ;;  %v1327_v22 = vpack.c.bf16 %v332_v21, %v331_v20  ;;  %v333_v23 = vld [vmem:[#allocation5 + $0x60] sm:$0xff]  ;;  %v334_v24 = vld [vmem:[#allocation5 + $0x68] sm:$0xff]  ;;  %v335_v26 = vld [vmem:[#allocation5 + $0x70] sm:$0xff]  ;;  %p1588_p1 = scmp.lt.s32.totalorder %s1020_s5, %s1020_s5 }
  0x94   :  { %v242_v1 = vld [vmem:[%s2025_s22] sm:$0xff]  ;;  %v1330_v25 = vpack.c.bf16 %v334_v24, %v333_v23  ;;  %v416_v30 = vld [vmem:[#allocation8 + $0x8] sm:$0xff]  ;;  %v417_v32 = vld [vmem:[#allocation8 + $0x10] sm:$0xff]  ;;  %s1583_s22 = scalar_lea.vmem %s1020_s5, 128 }
  0x95   :  { %v1871_v2 = vld [vmem:[%s2026_s23] sm:$0xff]  ;;  %1147 = vmatpush3.msra.mxu1 %v242_v1  ;;  %v420_v36 = vld [vmem:[#allocation8 + $0x28] sm:$0xff]  ;;  %v421_v38 = vld [vmem:[#allocation8 + $0x30] sm:$0xff]  ;;  %p1584_p0 = scmp.ne.s32.totalorder %s1020_s5, %s1583_s22  ;;  %p1589_p2 = scmp.lt.s32.totalorder %s1583_s22, %s1583_s22 }
  0x96   :  { %v160_v3 = vld [vmem:[%s2027_s7] sm:$0xff]  ;;  %1149 = vmatmul.mubr.msk.f32.vlgmr.msra.gmra.mrb[0].mxu1 %vm168_vm1, %v1871_v2  ;;  %1335 = vmatprep.subr.bf16.mxu1 %v1650_v9  ;;  %v424_v42 = vld [vmem:[#allocation8 + $0x48] sm:$0xff]  ;;  %v425_v51 = vld [vmem:[#allocation8 + $0x50] sm:$0xff] }
  0x97   :  { %1142 = vmatpush3.msra.mxu0 %v160_v3  ;;  %1218 = vmatprep.mubr.msk.f32.mxu1 %vm1649_vm0, %v1648_v0  ;;  %v336_v27 = vld [vmem:[#allocation5 + $0x78] sm:$0xff]  ;;  %v415_v29 = vld [vmem:[#allocation8] sm:$0xff]  ;;  %v428_v55 = vld [vmem:[#allocation8 + $0x68] sm:$0xff]  ;;  %p1590_p3 = por %p1589_p2, %p1588_p1 }
  0x98   :  { %1144 = vmatmul.mubr.msk.f32.vlgmr.msra.gmra.mrb[0].mxu0 %vm168_vm1, %v1871_v2  ;;  %1311 = vmatprep.subr.bf16.mxu0 %v1650_v9  ;;  %v1333_v28 = vpack.c.bf16 %v336_v27, %v335_v26  ;;  %v1336_v31 = vpack.c.bf16 %v416_v30, %v415_v29  ;;  %v418_v33 = vld [vmem:[#allocation8 + $0x18] sm:$0xff]  ;;  %v419_v35 = vld [vmem:[#allocation8 + $0x20] sm:$0xff]  ;;  %v429_v57 = vld [vmem:[#allocation8 + $0x70] sm:$0xff] }
  0x99   :  { %1183 = vmatprep.mubr.msk.f32.mxu0 %vm1649_vm0, %v1648_v0  ;;  %1313 = vmatpush3.bf16.msra.mxu0 %v1312_v7  ;;  %v1339_v34 = vpack.c.bf16 %v418_v33, %v417_v32  ;;  %v1342_v37 = vpack.c.bf16 %v420_v36, %v419_v35  ;;  %v422_v39 = vld [vmem:[#allocation8 + $0x38] sm:$0xff]  ;;  %v423_v41 = vld [vmem:[#allocation8 + $0x40] sm:$0xff]  ;;  %v824_v1 = vld [vmem:[#allocation11 + $0x8] sm:$0xff]  ;;  %p1591_p4 = pnand %p1590_p3, %p1584_p0 }
  0x9a   :  { %1314 = vmatprep.subr.bf16.mxu0 %v1650_v9  ;;  %1337 = vmatpush3.bf16.msra.mxu1 %v1336_v31  ;;  %v1345_v40 = vpack.c.bf16 %v422_v39, %v421_v38  ;;  %v1348_v43 = vpack.c.bf16 %v424_v42, %v423_v41  ;;  %v1047_v44 = vld [vmem:[#allocation2] ss:$0 sm:$0xff]  ;;  %v427_v54 = vld [vmem:[#allocation8 + $0x60] sm:$0xff]  ;;  %v825_v3 = vld [vmem:[#allocation11 + $0x10] sm:$0xff] }
  0x9b   :  { %1338 = vmatprep.subr.bf16.mxu1 %v1650_v9  ;;  %v426_v52 = vld [vmem:[#allocation8 + $0x58] sm:$0xff]  ;;  %v1354_v56 = vpack.c.bf16 %v428_v55, %v427_v54  ;;  %v823_v63 = vld [vmem:[#allocation11] sm:$0xff]  ;;  %v836_v30 = vld [vmem:[#allocation11 + $0x68] sm:$0xff] }
  0x9c   :  { %v1351_v53 = vpack.c.bf16 %v426_v52, %v425_v51  ;;  %v430_v58 = vld [vmem:[#allocation8 + $0x78] sm:$0xff]  ;;  %v1360_v4 = vpack.c.bf16 %v824_v1, %v823_v63  ;;  %v827_v15 = vld [vmem:[#allocation11 + $0x20] sm:$0xff]  ;;  %v918_v36 = vld [vmem:[#allocation13 + $0x8] sm:$0xff] }
  0x9d   :  { %1316 = vmatpush3.bf16.msra.mxu0 %v1315_v10  ;;  %v1357_v59 = vpack.c.bf16 %v430_v58, %v429_v57  ;;  %v512_v60 = vld [vmem:[%s2004_s11] sm:$0x7]  ;;  %v829_v18 = vld [vmem:[#allocation11 + $0x30] sm:$0xff]  ;;  %v831_v24 = vld [vmem:[#allocation11 + $0x40] sm:$0xff] }
  0x9e   :  { %1317 = vmatprep.subr.bf16.mxu0 %v1650_v9  ;;  %1340 = vmatpush3.bf16.msra.mxu1 %v1339_v34  ;;  %v159_v61 = vld [vmem:[%s2028_s30] sm:$0xff]  ;;  %v837_v32 = vld [vmem:[#allocation11 + $0x70] sm:$0xff]  ;;  %v922_v42 = vld [vmem:[#allocation13 + $0x28] sm:$0xff] }
  0x9f   :  { %1341 = vmatprep.subr.bf16.mxu1 %v1650_v9  ;;  %v670_v62 = vld [vmem:[%s2007_s14] sm:$0x7]  ;;  %v835_v29 = vld [vmem:[#allocation11 + $0x60] sm:$0xff]  ;;  %v1050_v54 = vld [vmem:[#allocation10] ss:$0 sm:$0xff] }
  0xa0   :  { %v826_v5 = vld [vmem:[#allocation11 + $0x18] sm:$0xff]  ;;  %v1378_v31 = vpack.c.bf16 %v836_v30, %v835_v29  ;;  %v917_v35 = vld [vmem:[#allocation13] sm:$0xff] }
  0xa1   :  { %1319 = vmatpush3.bf16.msra.mxu0 %v1318_v13  ;;  %v1363_v6 = vpack.c.bf16 %v826_v5, %v825_v3  ;;  %v1049_v7 = vld [vmem:[#allocation7] ss:$0 sm:$0xff]  ;;  %v1384_v38 = vpack.c.bf16 %v918_v36, %v917_v35  ;;  %v921_v41 = vld [vmem:[#allocation13 + $0x20] sm:$0xff]  ;;  %v1045_v51 = vld [vmem:[%s2029_s2] ss:$0 sm:$0xff] }
  0xa2   :  { %1320 = vmatprep.subr.bf16.mxu0 %v1650_v9  ;;  %1343 = vmatpush3.bf16.msra.mxu1 %v1342_v37  ;;  %v511_v12 = vld [vmem:[%s2003_s10] sm:$0xff]  ;;  %v919_v37 = vld [vmem:[#allocation13 + $0x10] sm:$0xff] }
  0xa3   :  { %1344 = vmatprep.subr.bf16.mxu1 %v1650_v9  ;;  %v669_v14 = vld [vmem:[%s2006_s13] sm:$0xff] }
  0xa4   :  { %v834_v27 = vld [vmem:[#allocation11 + $0x58] sm:$0xff] }
  0xa5   :  { %1322 = vmatpush3.bf16.msra.mxu0 %v1321_v16  ;;  %v828_v16 = vld [vmem:[#allocation11 + $0x28] sm:$0xff]  ;;  %v838_v33 = vld [vmem:[#allocation11 + $0x78] sm:$0xff] }
  0xa6   :  { %1323 = vmatprep.subr.bf16.mxu0 %v1650_v9  ;;  %1346 = vmatpush3.bf16.msra.mxu1 %v1345_v40  ;;  %v1366_v17 = vpack.c.bf16 %v828_v16, %v827_v15  ;;  %v1381_v34 = vpack.c.bf16 %v838_v33, %v837_v32  ;;  %v920_v39 = vld [vmem:[#allocation13 + $0x18] sm:$0xff] }
  0xa7   :  { %1347 = vmatprep.subr.bf16.mxu1 %v1650_v9  ;;  %v1387_v40 = vpack.c.bf16 %v920_v39, %v919_v37  ;;  %v928_v5 = vld [vmem:[#allocation13 + $0x58] sm:$0xff] }
  0xa9   :  { %1325 = vmatpush3.bf16.msra.mxu0 %v1324_v19  ;;  %v830_v19 = vld [vmem:[#allocation11 + $0x38] sm:$0xff] }
  0xaa   :  { %1326 = vmatprep.subr.bf16.mxu0 %v1650_v9  ;;  %1349 = vmatpush3.bf16.msra.mxu1 %v1348_v43  ;;  %v1369_v21 = vpack.c.bf16 %v830_v19, %v829_v18  ;;  %v1390_v43 = vpack.c.bf16 %v922_v42, %v921_v41 }
  0xab   :  { %1350 = vmatprep.subr.bf16.mxu1 %v1650_v9 }
  0xad   :  { %1328 = vmatpush3.bf16.msra.mxu0 %v1327_v22 }
  0xae   :  { %1329 = vmatprep.subr.bf16.mxu0 %v1650_v9  ;;  %1352 = vmatpush3.bf16.msra.mxu1 %v1351_v53 }
  0xaf   :  { %1353 = vmatprep.subr.bf16.mxu1 %v1650_v9 }
  0xb1   :  { %1331 = vmatpush3.bf16.msra.mxu0 %v1330_v25 }
  0xb2   :  { %1332 = vmatprep.subr.bf16.mxu0 %v1650_v9  ;;  %1355 = vmatpush3.bf16.msra.mxu1 %v1354_v56 }
  0xb3   :  { %1356 = vmatprep.subr.bf16.mxu1 %v1650_v9 }
  0xb5   :  { %1334 = vmatpush3.bf16.msra.mxu0 %v1333_v28 }
  0xb6   :  { %1221 = vmatprep.subr.mxu0 %v1648_v0  ;;  %1358 = vmatpush3.bf16.msra.mxu1 %v1357_v59 }
  0xb7   :  { %1226 = vmatprep.subr.mxu1 %v1648_v0 }
 0x169   :  { %v316_v45 = vpop.f32.mrb[0].mxu1 }
 0x16a   :  { %v317_v47 = vadd.f32 %v1047_v44, %v316_v45  ;;  %v1150_v48 = vpop.f32.mrb[1].mxu1  ;;  %v923_v44 = vld [vmem:[#allocation13 + $0x30] sm:$0xff]  ;;  %v924_v45 = vld [vmem:[#allocation13 + $0x38] sm:$0xff] }
 0x16b   :  { %v1899_v46 = vpop.f32.mrb[0].mxu0  ;;  %v925_v48 = vld [vmem:[#allocation13 + $0x40] sm:$0xff] }
 0x16c   :  { %v1145_v49 = vpop.f32.mrb[1].mxu0  ;;  %1421 = vtanh.f32 %v317_v47  ;;  %v1393_v47 = vpack.c.bf16 %v924_v45, %v923_v44  ;;  %v239_v52 = vadd.f32 %v1045_v51, %v1899_v46  ;;  %v927_v46 = vld [vmem:[#allocation13 + $0x50] sm:$0xff] }
 0x16d   :  { %v926_v49 = vld [vmem:[#allocation13 + $0x48] sm:$0xff] }
 0x176   :  { %v1422_v50 = vpop.eup %1421 }
 0x177   :  { %1184 = vmatmul.mubr.f32.vlgmr.msra.gmra.mrb[2].mxu0 %v1422_v50  ;;  %v1396_v50 = vpack.c.bf16 %v926_v49, %v925_v48 }
 0x178   :  { %1223 = vmatprep.mubr.msk.f32.mxu0 %vm1649_vm0, %v1648_v0  ;;  %1222 = vmatpush3.msk.msra.mxu0 %vm517_vm2, %v512_v60 }
 0x179   :  { %1231 = vmatprep.subr.mxu0 %v1648_v0 }
 0x17b   :  { %1224 = vmatmul.mubr.msk.f32.vlgmr.msra.gmra.mrb[4].mxu0 %vm513_vm3, %v159_v61 }
 0x17c   :  { %1233 = vmatprep.mubr.msk.f32.mxu0 %vm1649_vm0, %v1648_v0  ;;  %1232 = vmatpush3.msk.msra.mxu0 %vm517_vm2, %v670_v62  ;;  %v1058_v62 = vld [vmem:[%s2008_s15] ss:$0 sm:$0xff] }
 0x17d   :  { %1359 = vmatprep.subr.bf16.mxu0 %v1650_v9 }
 0x17f   :  { %1234 = vmatmul.mubr.msk.f32.vlgmr.msra.gmra.mrb[6].mxu0 %vm513_vm3, %v159_v61 }
 0x180   :  { %1273 = vmatprep.mubr.msk.f32.mxu0 %vm1649_vm0, %v1648_v0  ;;  %1361 = vmatpush3.bf16.msra.mxu0 %v1360_v4 }
 0x181   :  { %1362 = vmatprep.subr.bf16.mxu0 %v1650_v9 }
 0x184   :  { %1364 = vmatpush3.bf16.msra.mxu0 %v1363_v6  ;;  %v1399_v6 = vpack.c.bf16 %v928_v5, %v927_v46 }
 0x185   :  { %1365 = vmatprep.subr.bf16.mxu0 %v1650_v9 }
 0x188   :  { %1367 = vmatpush3.bf16.msra.mxu0 %v1366_v17 }
 0x189   :  { %1368 = vmatprep.subr.bf16.mxu0 %v1650_v9 }
 0x18c   :  { %1370 = vmatpush3.bf16.msra.mxu0 %v1369_v21 }
 0x18d   :  { %1371 = vmatprep.subr.bf16.mxu0 %v1650_v9 }
 0x24a   :  { %v410_v8 = vpop.f32.mrb[2].mxu0 }
 0x24b   :  { %v411_v10 = vadd.f32 %v1049_v7, %v410_v8  ;;  %v1185_v11 = vpop.f32.mrb[3].mxu0  ;;  %v929_v7 = vld [vmem:[#allocation13 + $0x60] sm:$0xff]  ;;  %v930_v8 = vld [vmem:[#allocation13 + $0x68] sm:$0xff] }
 0x24c   :  { %v931_v11 = vld [vmem:[#allocation13 + $0x70] sm:$0xff] }
 0x24d   :  { %1423 = vtanh.f32 %v411_v10  ;;  %v1402_v10 = vpack.c.bf16 %v930_v8, %v929_v7 }
 0x24e   :  { %v587_v20 = vpop.f32.mrb[4].mxu0 }
 0x24f   :  { %v1225_v22 = vpop.f32.mrb[5].mxu0 }
 0x252   :  { %v740_v23 = vpop.f32.mrb[6].mxu0 }
 0x253   :  { %v1235_v25 = vpop.f32.mrb[7].mxu0 }
 0x257   :  { %v1424_v13 = vpop.eup %1423 }
 0x258   :  { %1219 = vmatmul.mubr.f32.vlgmr.msra.gmra.mrb[2].mxu1 %v1424_v13 }
 0x259   :  { %1227 = vmatpush3.msra.mxu1 %v511_v12  ;;  %1228 = vmatprep.mubr.msk.f32.mxu1 %vm1649_vm0, %v1648_v0  ;;  %v932_v12 = vld [vmem:[#allocation13 + $0x78] sm:$0xff] }
 0x25a   :  { %1236 = vmatprep.subr.mxu1 %v1648_v0  ;;  %v1405_v13 = vpack.c.bf16 %v932_v12, %v931_v11 }
 0x25c   :  { %1229 = vmatmul.mubr.msk.f32.vlgmr.msra.gmra.mrb[4].mxu1 %vm168_vm1, %v1871_v2 }
 0x25d   :  { %1237 = vmatpush3.msra.mxu1 %v669_v14  ;;  %1238 = vmatprep.mubr.msk.f32.mxu1 %vm1649_vm0, %v1648_v0  ;;  %v1059_v14 = vld [vmem:[%s2010_s17] ss:$0 sm:$0xff] }
 0x25e   :  { %1383 = vmatprep.subr.bf16.mxu1 %v1650_v9 }
 0x260   :  { %1239 = vmatmul.mubr.msk.f32.vlgmr.msra.gmra.mrb[6].mxu1 %vm168_vm1, %v1871_v2  ;;  %v832_v2 = vld [vmem:[#allocation11 + $0x48] sm:$0xff] }
 0x261   :  { %1308 = vmatprep.mubr.msk.f32.mxu1 %vm1649_vm0, %v1648_v0  ;;  %v1372_v26 = vpack.c.bf16 %v832_v2, %v831_v24  ;;  %v833_v0 = vld [vmem:[#allocation11 + $0x50] sm:$0xff]  ;;  %1385 = vmatpush3.bf16.msra.mxu1 %v1384_v38 }
 0x262   :  { %v1375_v28 = vpack.c.bf16 %v834_v27, %v833_v0  ;;  %1386 = vmatprep.subr.bf16.mxu1 %v1650_v9 }
 0x263   :  { %1373 = vmatpush3.bf16.msra.mxu0 %v1372_v26 }
 0x264   :  { %1374 = vmatprep.subr.bf16.mxu0 %v1650_v9 }
 0x265   :  { %1388 = vmatpush3.bf16.msra.mxu1 %v1387_v40 }
 0x266   :  { %1389 = vmatprep.subr.bf16.mxu1 %v1650_v9 }
 0x267   :  { %1376 = vmatpush3.bf16.msra.mxu0 %v1375_v28 }
 0x268   :  { %1377 = vmatprep.subr.bf16.mxu0 %v1650_v9 }
 0x269   :  { %1391 = vmatpush3.bf16.msra.mxu1 %v1390_v43 }
 0x26a   :  { %1392 = vmatprep.subr.bf16.mxu1 %v1650_v9 }
 0x26b   :  { %1379 = vmatpush3.bf16.msra.mxu0 %v1378_v31 }
 0x26c   :  { %1380 = vmatprep.subr.bf16.mxu0 %v1650_v9 }
 0x26d   :  { %1394 = vmatpush3.bf16.msra.mxu1 %v1393_v47 }
 0x26e   :  { %1395 = vmatprep.subr.bf16.mxu1 %v1650_v9 }
 0x26f   :  { %1382 = vmatpush3.bf16.msra.mxu0 %v1381_v34 }
 0x271   :  { %1397 = vmatpush3.bf16.msra.mxu1 %v1396_v50 }
 0x272   :  { %1398 = vmatprep.subr.bf16.mxu1 %v1650_v9 }
 0x275   :  { %1400 = vmatpush3.bf16.msra.mxu1 %v1399_v6 }
 0x276   :  { %1401 = vmatprep.subr.bf16.mxu1 %v1650_v9 }
 0x279   :  { %1403 = vmatpush3.bf16.msra.mxu1 %v1402_v10 }
 0x27a   :  { %1404 = vmatprep.subr.bf16.mxu1 %v1650_v9 }
 0x27d   :  { %1406 = vmatpush3.bf16.msra.mxu1 %v1405_v13 }
 0x32b   :  { %v497_v53 = vpop.f32.mrb[2].mxu1 }
 0x32c   :  { %v501_v55 = vadd.f32 %v497_v53, %v239_v52  ;;  %v1220_v56 = vpop.f32.mrb[3].mxu1 }
 0x32e   :  { %v509_v57 = vadd.f32 %v1050_v54, %v501_v55 }
 0x32f   :  { %v657_v58 = vpop.f32.mrb[4].mxu1 }
 0x330   :  { %510 = vst [vmem:[#allocation14] sm:$0xff] %v509_v57  ;;  %v658_v59 = vadd.f32 %v657_v58, %v587_v20  ;;  %v1230_v60 = vpop.f32.mrb[5].mxu1 }
 0x333   :  { %v810_v61 = vpop.f32.mrb[6].mxu1 }
 0x334   :  { %v811_v63 = vadd.f32 %v810_v61, %v740_v23  ;;  %v1240_v1 = vpop.f32.mrb[7].mxu1 }
 0x336   :  { %v821_v3 = vadd.f32 %v1058_v62, %v811_v63 }
 0x338   :  { %1425 = vtanh.f32 %v821_v3 }
 0x342   :  { %v1426_v4 = vpop.eup %1425 }
 0x343   :  { %1274 = vmatmul.mubr.f32.vlgmr.msra.gmra.mrb[8].mxu0 %v1426_v4 }
 0x416   :  { %v912_v15 = vpop.f32.mrb[8].mxu0 }
 0x417   :  { %v913_v16 = vadd.f32 %v1059_v14, %v912_v15  ;;  %v1275_v17 = vpop.f32.mrb[9].mxu0 }
 0x419   :  { %1427 = vtanh.f32 %v913_v16 }
 0x423   :  { %v1428_v18 = vpop.eup %1427 }
 0x424   :  { %1309 = vmatmul.mubr.f32.vlgmr.msra.gmra.mrb[8].mxu1 %v1428_v18 }
 0x425   :  { %1594 = shalt.err (!%p1591_p4)
}
 0x426   :  { %s1595_s17 = scalar_lea.hbm %s2013_s20, 128 }
 0x427   :  { %p1596_p5 = scmp.ne.s32.totalorder %s2013_s20, %s1595_s17  ;;  %p1599_p6 = scmp.lt.u32.totalorder %s1595_s17, %s2013_s20 }
 0x429   :  { %p1601_p7 = pnand %p1599_p6, %p1596_p5 }
 0x42b   :  { %1604 = shalt.err (!%p1601_p7)
}
 0x42c   :  { %1022 = dma.vmem_to_hbm [thread:$0]  %s1020_s5, 128, %s2013_s20, [#allocation4]   ;;  %v1054_v9 = vld [vmem:[%s2005_s12] ss:$0 sm:$0xff] }
 0x42d   :  { %v668_v19 = vadd.f32 %v1054_v9, %v658_v59  ;;  %v1060_v21 = vld [vmem:[%s2012_s19] ss:$0 sm:$0xff]  ;;  %s1652_s29 = smov [#allocation15]  }
 0x42e   :  { %s1029_s11 = sshll.u32 %s1652_s29, 4  ;;  %s1030_s11 = int_to_ptr.vmem [resolvable:$true] %s1029_s11 }
 0x42f   :  { %s1605_s14 = scalar_lea.vmem %s1030_s11, 128  ;;  %p1610_p9 = scmp.lt.s32.totalorder %s1030_s11, %s1030_s11 }
 0x430   :  { %p1606_p8 = scmp.ne.s32.totalorder %s1030_s11, %s1605_s14  ;;  %p1611_p10 = scmp.lt.s32.totalorder %s1605_s14, %s1605_s14 }
 0x432   :  { %p1612_p11 = por %p1611_p10, %p1610_p9 }
 0x434   :  { %p1613_p12 = pnand %p1612_p11, %p1606_p8 }
 0x4f7   :  { %v999_v20 = vpop.f32.mrb[8].mxu1 }
 0x4f8   :  { %v1003_v22 = vadd.f32 %v999_v20, %v668_v19  ;;  %v1310_v23 = vpop.f32.mrb[9].mxu1 }
 0x4fa   :  { %v1011_v24 = vadd.f32 %v1060_v21, %v1003_v22 }
 0x4fc   :  { %1012 = vst [vmem:[#allocation15] sm:$0xff] %v1011_v24 }
 0x4fd   :  { %1616 = shalt.err (!%p1613_p12)
}
 0x4fe   :  { %s2030_s27 = sld [smem:[#allocation29_spill]] }
 0x504   :  { %s1617_s8 = scalar_lea.hbm %s2030_s27, 128 }
 0x505   :  { %p1618_p13 = scmp.ne.s32.totalorder %s2030_s27, %s1617_s8  ;;  %p1621_p0 = scmp.lt.u32.totalorder %s1617_s8, %s2030_s27 }
 0x507   :  { %p1623_p1 = pnand %p1621_p0, %p1618_p13 }
 0x509   :  { %1626 = shalt.err (!%p1623_p1)
}
 0x50a   :  { %1032 = dma.vmem_to_hbm [thread:$0]  %s1030_s11, 128, %s2030_s27, [#allocation16]  }
 0x50b   :  { %1635 = dma.done.wait [#allocation4], 128  }
 0x50c   :  { %1636 = vsyncadd [#allocation4], 4294967168 }
 0x50d   :  { %1637 = dma.done.wait [#allocation16], 128  }
 0x50e   :  { %1638 = vsyncadd [#allocation16], 4294967168 }
 0x50f   :  { %1039 = vsyncpa [#allocation3], 1 }
 0x510   :  { %1040 = vsyncpa [#allocation6], 1 }
 0x511   :  { %1041 = vsyncpa [#allocation9], 1 }
 0x512   :  { %1042 = vsyncpa [#allocation12], 1 }
 0x513   :  { %1043 = vsyncpa [#allocation4], 1 }
 0x514   :  { %1044 = vsyncpa [#allocation16], 1 }

</bundles_post_ra>
